<compile_context>
chip_gen: v5e
topology: v5e:2x2
jax: 0.10.0
libtpu: 0.0.40
codegen_flags: <defaults>
</compile_context>

<pallas_src>
import functools

import jax
import jax.numpy as jnp
from jax import lax
from jax.experimental import pallas as pl
from jax.experimental.pallas import tpu as pltpu

_NEG_INF = -1e30  # masked_softmax fill value (standard QANet-style masking)


def _cqattn_prj_kernel(ctx_ref, qry_ref, cmask_ref, qmask_ref,
                       wc_ref, wq_ref, wcq_ref, wprj_ref,
                       o_ref, feat_ref, *, hidden_dim):
    H = hidden_dim
    f32 = jnp.float32
    dn_nt = (((1,), (1,)), ((), ()))  # contract last dims:   A @ B^T
    dn_tn = (((0,), (0,)), ((), ()))  # contract first dims:  A^T @ B

    ctx = ctx_ref[0].astype(f32)      # (Lc, H)
    qry = qry_ref[0].astype(f32)      # (Lq, H)
    cmask = cmask_ref[0]              # (Lc, 1)
    qmask = qmask_ref[0]              # (1, Lq)

    w_c = wc_ref[...].astype(f32)     # (1, H)
    w_q = wq_ref[...].astype(f32)     # (1, H)
    w_cq = wcq_ref[...].astype(f32)   # (1, H)

    # ---- trilinear similarity terms -----------------------------------------
    # Genuine (Lc,H)x(Lq,H)^T matmul -> MXU.
    res_cq = lax.dot_general(ctx * w_cq, qry, dn_nt, preferred_element_type=f32)  # (Lc, Lq)
    # Rank-1 matvec -> VPU mul + XLU lane-reduce instead of a degenerate MXU pass.
    res_c = jnp.sum(ctx * w_c, axis=-1, keepdims=True)                            # (Lc, 1)
    # Needs a (1, Lq) row layout; the tiny (1,H)@(H->Lq) dot is cheaper than a
    # sublane->lane relayout of a lane-reduced (Lq,1) vector.
    res_q = lax.dot_general(w_q, qry, dn_nt, preferred_element_type=f32)          # (1, Lq)
    # The trilinear bias and the "other" rank-1 term cancel inside each softmax
    # (shift invariance), so the full S = res_cq + res_c + res_q + bias is never built.

    # ---- masked softmax over the ctx axis (rows), fully normalized ----------
    s_c = jnp.where(cmask > 0, res_cq + res_c, _NEG_INF)
    e_c = jnp.exp(s_c - jnp.max(s_c, axis=0, keepdims=True))
    s_ctx = e_c * pl.reciprocal(jnp.sum(e_c, axis=0, keepdims=True))              # (Lc, Lq)

    # ---- masked softmax over the query axis (cols), normalization deferred --
    s_q = jnp.where(qmask > 0, res_cq + res_q, _NEG_INF)
    e_q = jnp.exp(s_q - jnp.max(s_q, axis=1, keepdims=True))                      # (Lc, Lq)
    r_q = pl.reciprocal(jnp.sum(e_q, axis=1, keepdims=True))                      # (Lc, 1)

    # ---- attended representations --------------------------------------------
    # Reassociated: t = s_ctx^T @ ctx (Lq,H), then q = s_query @ t — no (Lc,Lc) slab.
    t = lax.dot_general(s_ctx, ctx, dn_tn, preferred_element_type=f32)            # (Lq, H)
    p = jnp.dot(e_q, qry, preferred_element_type=f32) * r_q                       # (Lc, H)
    q = jnp.dot(e_q, t, preferred_element_type=f32) * r_q                         # (Lc, H)

    # ---- fused concat + Linear(4H -> H, bias=False) ---------------------------
    # Stage the (Lc, 4H) feature slab in VMEM, then one K=4H matmul; the (4H,H)
    # weight is consumed directly by the MXU (never held/sliced as a live value).
    feat_ref[:, 0 * H:1 * H] = ctx
    feat_ref[:, 1 * H:2 * H] = p
    feat_ref[:, 2 * H:3 * H] = ctx * p
    feat_ref[:, 3 * H:4 * H] = ctx * q
    out = jnp.dot(feat_ref[...], wprj_ref[...].astype(f32), preferred_element_type=f32)
    o_ref[0] = out.astype(o_ref.dtype)


def cqattn_project(ctx, query, ctx_mask, query_mask, params):
    """Fused ContextQueryAttention + projection for one direction.

    ctx: (B, Lc, H); query: (B, Lq, H); ctx_mask: (B, Lc); query_mask: (B, Lq)
    params: w_C (H,1), w_Q (H,1), w_CQ (H,1), bias (1,), w_prj (H, 4H)
    returns: (B, Lc, H)
    """
    B, Lc, H = ctx.shape
    Lq = query.shape[1]

    # Cheap layout glue only (no extra full-tensor HBM passes).
    cmask = ctx_mask.astype(jnp.float32).reshape(B, Lc, 1)
    qmask = query_mask.astype(jnp.float32).reshape(B, 1, Lq)
    w_c = params["w_C"].reshape(1, H)
    w_q = params["w_Q"].reshape(1, H)
    w_cq = params["w_CQ"].reshape(1, H)
    w_prj_t = params["w_prj"].T  # (4H, H)
    # params["bias"] is intentionally not passed: it shifts every similarity entry
    # by the same constant and cancels in both softmaxes, so it cannot affect the output.

    kernel = functools.partial(_cqattn_prj_kernel, hidden_dim=H)

    # VMEM budget: double-buffered per-batch blocks + resident weights + in-kernel
    # temporaries + headroom, clamped to stay sane on v5e/v6e/v7x.
    f32b = 4
    block_bytes = f32b * (2 * Lc * H + Lq * H + Lc + Lq)            # ctx/out + qry + masks
    weight_bytes = f32b * (3 * H + 4 * H * H)
    temp_bytes = f32b * (4 * Lc * Lq + 4 * Lc * H + Lq * H + 4 * Lc * H)
    vmem_limit = int(min(max(2 * (block_bytes + weight_bytes) + temp_bytes + (8 << 20),
                             32 << 20), 64 << 20))

    return pl.pallas_call(
        kernel,
        out_shape=jax.ShapeDtypeStruct((B, Lc, H), ctx.dtype),
        grid_spec=pltpu.PrefetchScalarGridSpec(
            num_scalar_prefetch=0,
            grid=(B,),
            in_specs=[
                pl.BlockSpec((1, Lc, H), lambda b: (b, 0, 0)),
                pl.BlockSpec((1, Lq, H), lambda b: (b, 0, 0)),
                pl.BlockSpec((1, Lc, 1), lambda b: (b, 0, 0)),
                pl.BlockSpec((1, 1, Lq), lambda b: (b, 0, 0)),
                pl.BlockSpec((1, H), lambda b: (0, 0)),
                pl.BlockSpec((1, H), lambda b: (0, 0)),
                pl.BlockSpec((1, H), lambda b: (0, 0)),
                pl.BlockSpec((4 * H, H), lambda b: (0, 0)),
            ],
            out_specs=pl.BlockSpec((1, Lc, H), lambda b: (b, 0, 0)),
            scratch_shapes=[pltpu.VMEM((Lc, 4 * H), jnp.float32)],
        ),
        # Batch axis is independent work -> "parallel" (megacore / v7x 2-TC sharding).
        compiler_params=pltpu.CompilerParams(
            dimension_semantics=("parallel",),
            vmem_limit_bytes=vmem_limit),
    )(ctx, query, cmask, qmask, w_c, w_q, w_cq, w_prj_t)


def repr_aggregator(repr1, repr2, repr1_mask, repr2_mask, params):
    """Matches ReprAggregator.forward: same cqattn + projection applied both ways."""
    out1 = cqattn_project(repr1, repr2, repr1_mask, repr2_mask, params)
    out2 = cqattn_project(repr2, repr1, repr2_mask, repr1_mask, params)
    return out1, out2


# --------------------------- pure-JAX reference --------------------------------
def _masked_softmax(x, mask, axis):
    x = jnp.where(mask > 0, x, _NEG_INF)
    x = x - jnp.max(x, axis=axis, keepdims=True)
    e = jnp.exp(x)
    return e / jnp.sum(e, axis=axis, keepdims=True)


def _cqattn_project_ref(ctx, query, ctx_mask, query_mask, params):
    f32 = jnp.float32
    w_c = params["w_C"][:, 0].astype(f32)
    w_q = params["w_Q"][:, 0].astype(f32)
    w_cq = params["w_CQ"][:, 0].astype(f32)
    bias = params["bias"].astype(f32)[0]
    w_prj = params["w_prj"].astype(f32)  # (H, 4H)

    ctx32 = ctx.astype(f32)
    qry32 = query.astype(f32)
    res_c = jnp.einsum("bih,h->bi", ctx32, w_c)[:, :, None]
    res_q = jnp.einsum("bjh,h->bj", qry32, w_q)[:, None, :]
    res_cq = jnp.einsum("bih,bjh->bij", ctx32 * w_cq[None, None, :], qry32)
    s = res_c + res_q + res_cq + bias

    s_ctx = _masked_softmax(s, ctx_mask.astype(f32)[:, :, None], axis=1)
    s_query = _masked_softmax(s, query_mask.astype(f32)[:, None, :], axis=2)

    p = jnp.einsum("bij,bjh->bih", s_query, qry32)
    a = jnp.einsum("biq,bkq->bik", s_query, s_ctx)
    q = jnp.einsum("bik,bkh->bih", a, ctx32)

    feat = jnp.concatenate([ctx32, p, ctx32 * p, ctx32 * q], axis=2)  # (B, Lc, 4H)
    return jnp.einsum("bif,hf->bih", feat, w_prj).astype(ctx.dtype)


if __name__ == "__main__":
    # Keep f32 matmuls full precision in both kernel and reference.
    jax.config.update("jax_default_matmul_precision", "highest")

    B, H, L1, L2 = 2, 32, 16, 8

    key = jax.random.PRNGKey(0)
    k1, k2, k3, k4, k5, k6 = jax.random.split(key, 6)

    repr1 = jax.random.normal(k1, (B, L1, H), dtype=jnp.float32)
    repr2 = jax.random.normal(k2, (B, L2, H), dtype=jnp.float32)

    # Binary masks with some padded (invalid) positions, never fully masked.
    repr1_mask = (jnp.arange(L1)[None, :] < jnp.array([[12], [16]])).astype(jnp.float32)
    repr2_mask = (jnp.arange(L2)[None, :] < jnp.array([[6], [8]])).astype(jnp.float32)

    # Deterministic params mimicking the PyTorch init (bias is learnable, so use a
    # non-zero value here to exercise the softmax shift-invariance optimization).
    bound_v = (6.0 / (H + 1)) ** 0.5
    w_C = jax.random.uniform(k3, (H, 1), jnp.float32, -bound_v, bound_v)
    w_Q = jax.random.uniform(k4, (H, 1), jnp.float32, -bound_v, bound_v)
    w_CQ = jax.random.uniform(k5, (H, 1), jnp.float32, -bound_v, bound_v)
    bias = jnp.full((1,), 0.3, jnp.float32)
    bound_prj = 1.0 / ((4 * H) ** 0.5)
    w_prj = jax.random.uniform(k6, (H, 4 * H), jnp.float32, -bound_prj, bound_prj)

    params = dict(w_C=w_C, w_Q=w_Q, w_CQ=w_CQ, bias=bias, w_prj=w_prj)

    out1, out2 = repr_aggregator(repr1, repr2, repr1_mask, repr2_mask, params)
    out1, out2 = jax.block_until_ready((out1, out2))

    ref1 = _cqattn_project_ref(repr1, repr2, repr1_mask, repr2_mask, params)
    ref2 = _cqattn_project_ref(repr2, repr1, repr2_mask, repr1_mask, params)

    assert out1.shape == (B, L1, H) and out2.shape == (B, L2, H)
    assert jnp.allclose(out1, ref1, atol=1e-3, rtol=1e-3), float(jnp.max(jnp.abs(out1 - ref1)))
    assert jnp.allclose(out2, ref2, atol=1e-3, rtol=1e-3), float(jnp.max(jnp.abs(out2 - ref2)))

    print("KERNEL_OK")
</pallas_src>

<mosaic_0001>
module attributes {stable_mosaic.version = 11 : i64} {
  func.func @_cqattn_prj_kernel(%arg0: i32, %arg1: memref<1x16x32xf32, #tpu.memory_space<vmem>>, %arg2: memref<1x8x32xf32, #tpu.memory_space<vmem>>, %arg3: memref<1x16x1xf32, #tpu.memory_space<vmem>>, %arg4: memref<1x1x8xf32, #tpu.memory_space<vmem>>, %arg5: memref<1x32xf32, #tpu.memory_space<vmem>>, %arg6: memref<1x32xf32, #tpu.memory_space<vmem>>, %arg7: memref<1x32xf32, #tpu.memory_space<vmem>>, %arg8: memref<128x32xf32, #tpu.memory_space<vmem>>, %arg9: memref<1x16x32xf32, #tpu.memory_space<vmem>>, %arg10: memref<16x128xf32, #tpu.memory_space<vmem>>) attributes {dimension_semantics = [#tpu.dimension_semantics<parallel>], iteration_bounds = array<i64: 2>, scalar_prefetch = 0 : i64, scratch_operands = 1 : i64, tpu.core_type = #tpu.core_type<tc>, window_params = [{transform_indices = @transform_0, window_bounds = array<i64: 1, 16, 32>}, {transform_indices = @transform_1, window_bounds = array<i64: 1, 8, 32>}, {transform_indices = @transform_2, window_bounds = array<i64: 1, 16, 1>}, {transform_indices = @transform_3, window_bounds = array<i64: 1, 1, 8>}, {pipeline_mode = #tpu.pipeline_mode<synchronous>, transform_indices = @transform_4, window_bounds = array<i64: 1, 32>}, {pipeline_mode = #tpu.pipeline_mode<synchronous>, transform_indices = @transform_5, window_bounds = array<i64: 1, 32>}, {pipeline_mode = #tpu.pipeline_mode<synchronous>, transform_indices = @transform_6, window_bounds = array<i64: 1, 32>}, {pipeline_mode = #tpu.pipeline_mode<synchronous>, transform_indices = @transform_7, window_bounds = array<i64: 128, 32>}, {transform_indices = @transform_8, window_bounds = array<i64: 1, 16, 32>}]} {
    %c0 = arith.constant 0 : index
    %c0_0 = arith.constant 0 : index
    %c0_1 = arith.constant 0 : index
    %0 = vector.load %arg1[%c0, %c0_0, %c0_1] : memref<1x16x32xf32, #tpu.memory_space<vmem>>, vector<1x16x32xf32>
    %1 = vector.shape_cast %0 : vector<1x16x32xf32> to vector<16x32xf32>
    %c0_2 = arith.constant 0 : index
    %c0_3 = arith.constant 0 : index
    %c0_4 = arith.constant 0 : index
    %2 = vector.load %arg2[%c0_2, %c0_3, %c0_4] : memref<1x8x32xf32, #tpu.memory_space<vmem>>, vector<1x8x32xf32>
    %3 = vector.shape_cast %2 : vector<1x8x32xf32> to vector<8x32xf32>
    %c0_5 = arith.constant 0 : index
    %c0_6 = arith.constant 0 : index
    %c0_7 = arith.constant 0 : index
    %4 = vector.load %arg3[%c0_5, %c0_6, %c0_7] : memref<1x16x1xf32, #tpu.memory_space<vmem>>, vector<1x16x1xf32>
    %5 = vector.shape_cast %4 : vector<1x16x1xf32> to vector<16x1xf32>
    %c0_8 = arith.constant 0 : index
    %c0_9 = arith.constant 0 : index
    %c0_10 = arith.constant 0 : index
    %6 = vector.load %arg4[%c0_8, %c0_9, %c0_10] : memref<1x1x8xf32, #tpu.memory_space<vmem>>, vector<1x1x8xf32>
    %7 = vector.shape_cast %6 : vector<1x1x8xf32> to vector<1x8xf32>
    %c0_11 = arith.constant 0 : index
    %c0_12 = arith.constant 0 : index
    %8 = vector.load %arg5[%c0_11, %c0_12] : memref<1x32xf32, #tpu.memory_space<vmem>>, vector<1x32xf32>
    %c0_13 = arith.constant 0 : index
    %c0_14 = arith.constant 0 : index
    %9 = vector.load %arg6[%c0_13, %c0_14] : memref<1x32xf32, #tpu.memory_space<vmem>>, vector<1x32xf32>
    %c0_15 = arith.constant 0 : index
    %c0_16 = arith.constant 0 : index
    %10 = vector.load %arg7[%c0_15, %c0_16] : memref<1x32xf32, #tpu.memory_space<vmem>>, vector<1x32xf32>
    %11 = vector.broadcast %10 : vector<1x32xf32> to vector<16x32xf32>
    %12 = arith.mulf %1, %11 : vector<16x32xf32>
    %cst = arith.constant dense<0.000000e+00> : vector<16x8xf32>
    %13 = tpu.matmul %12, %3, %cst {dimension_numbers = #tpu.dot_dimension_numbers<[1], [1], [0], [0], [0, 0, 1, 0], [], []>, precision = #tpu.contract_precision<fp32>} : vector<16x32xf32>, vector<8x32xf32>, vector<16x8xf32> -> vector<16x8xf32>
    %14 = vector.broadcast %8 : vector<1x32xf32> to vector<16x32xf32>
    %15 = arith.mulf %1, %14 : vector<16x32xf32>
    %cst_17 = arith.constant dense<0.000000e+00> : vector<16xf32>
    %16 = vector.multi_reduction <add>, %15, %cst_17 [1] : vector<16x32xf32> to vector<16xf32>
    %17 = vector.shape_cast %16 : vector<16xf32> to vector<16x1xf32>
    %cst_18 = arith.constant dense<0.000000e+00> : vector<1x8xf32>
    %18 = tpu.matmul %9, %3, %cst_18 {dimension_numbers = #tpu.dot_dimension_numbers<[1], [1], [0], [0], [0, 0, 1, 0], [], []>, precision = #tpu.contract_precision<fp32>} : vector<1x32xf32>, vector<8x32xf32>, vector<1x8xf32> -> vector<1x8xf32>
    %cst_19 = arith.constant 0.000000e+00 : f32
    %19 = vector.broadcast %cst_19 : f32 to vector<16x1xf32>
    %20 = arith.cmpf ogt, %5, %19 : vector<16x1xf32>
    %21 = vector.broadcast %17 : vector<16x1xf32> to vector<16x8xf32>
    %22 = arith.addf %13, %21 : vector<16x8xf32>
    %cst_20 = arith.constant -1.000000e+30 : f32
    %23 = vector.shape_cast %20 : vector<16x1xi1> to vector<16x1xi1>
    %24 = vector.broadcast %23 : vector<16x1xi1> to vector<16x8xi1>
    %25 = vector.broadcast %cst_20 : f32 to vector<16x8xf32>
    %26 = arith.select %24, %22, %25 : vector<16x8xi1>, vector<16x8xf32>
    %cst_21 = arith.constant dense<0xFF800000> : vector<8xf32>
    %27 = vector.multi_reduction <maximumf>, %26, %cst_21 [0] : vector<16x8xf32> to vector<8xf32>
    %28 = vector.shape_cast %27 : vector<8xf32> to vector<1x8xf32>
    %29 = vector.broadcast %28 : vector<1x8xf32> to vector<16x8xf32>
    %30 = arith.subf %26, %29 : vector<16x8xf32>
    %31 = math.exp %30 : vector<16x8xf32>
    %cst_22 = arith.constant dense<0.000000e+00> : vector<8xf32>
    %32 = vector.multi_reduction <add>, %31, %cst_22 [0] : vector<16x8xf32> to vector<8xf32>
    %33 = vector.shape_cast %32 : vector<8xf32> to vector<1x8xf32>
    %34 = tpu.reciprocal %33 : vector<1x8xf32> -> vector<1x8xf32>
    %35 = vector.broadcast %34 : vector<1x8xf32> to vector<16x8xf32>
    %36 = arith.mulf %31, %35 : vector<16x8xf32>
    %cst_23 = arith.constant 0.000000e+00 : f32
    %37 = vector.broadcast %cst_23 : f32 to vector<1x8xf32>
    %38 = arith.cmpf ogt, %7, %37 : vector<1x8xf32>
    %39 = vector.broadcast %18 : vector<1x8xf32> to vector<16x8xf32>
    %40 = arith.addf %13, %39 : vector<16x8xf32>
    %cst_24 = arith.constant -1.000000e+30 : f32
    %41 = vector.shape_cast %38 : vector<1x8xi1> to vector<1x8xi1>
    %42 = vector.broadcast %41 : vector<1x8xi1> to vector<16x8xi1>
    %43 = vector.broadcast %cst_24 : f32 to vector<16x8xf32>
    %44 = arith.select %42, %40, %43 : vector<16x8xi1>, vector<16x8xf32>
    %cst_25 = arith.constant dense<0xFF800000> : vector<16xf32>
    %45 = vector.multi_reduction <maximumf>, %44, %cst_25 [1] : vector<16x8xf32> to vector<16xf32>
    %46 = vector.shape_cast %45 : vector<16xf32> to vector<16x1xf32>
    %47 = vector.broadcast %46 : vector<16x1xf32> to vector<16x8xf32>
    %48 = arith.subf %44, %47 : vector<16x8xf32>
    %49 = math.exp %48 : vector<16x8xf32>
    %cst_26 = arith.constant dense<0.000000e+00> : vector<16xf32>
    %50 = vector.multi_reduction <add>, %49, %cst_26 [1] : vector<16x8xf32> to vector<16xf32>
    %51 = vector.shape_cast %50 : vector<16xf32> to vector<16x1xf32>
    %52 = tpu.reciprocal %51 : vector<16x1xf32> -> vector<16x1xf32>
    %cst_27 = arith.constant dense<0.000000e+00> : vector<8x32xf32>
    %53 = tpu.matmul %36, %1, %cst_27 {dimension_numbers = #tpu.dot_dimension_numbers<[0], [0], [1], [1], [0, 1, 1, 1], [], []>, precision = #tpu.contract_precision<fp32>} : vector<16x8xf32>, vector<16x32xf32>, vector<8x32xf32> -> vector<8x32xf32>
    %cst_28 = arith.constant dense<0.000000e+00> : vector<16x32xf32>
    %54 = tpu.matmul %49, %3, %cst_28 {dimension_numbers = #tpu.dot_dimension_numbers<[1], [0], [0], [1], [0, 0, 1, 1], [], []>, precision = #tpu.contract_precision<fp32>} : vector<16x8xf32>, vector<8x32xf32>, vector<16x32xf32> -> vector<16x32xf32>
    %55 = vector.broadcast %52 : vector<16x1xf32> to vector<16x32xf32>
    %56 = arith.mulf %54, %55 : vector<16x32xf32>
    %cst_29 = arith.constant dense<0.000000e+00> : vector<16x32xf32>
    %57 = tpu.matmul %49, %53, %cst_29 {dimension_numbers = #tpu.dot_dimension_numbers<[1], [0], [0], [1], [0, 0, 1, 1], [], []>, precision = #tpu.contract_precision<fp32>} : vector<16x8xf32>, vector<8x32xf32>, vector<16x32xf32> -> vector<16x32xf32>
    %58 = vector.broadcast %52 : vector<16x1xf32> to vector<16x32xf32>
    %59 = arith.mulf %57, %58 : vector<16x32xf32>
    %c0_30 = arith.constant 0 : index
    %c0_31 = arith.constant 0 : index
    %60 = vector.load %arg10[%c0_30, %c0_31] : memref<16x128xf32, #tpu.memory_space<vmem>>, vector<16x32xf32>
    tpu.vector_store %arg10[%c0_30, %c0_31], %1 {strides = array<i32>} : memref<16x128xf32, #tpu.memory_space<vmem>>, vector<16x32xf32>,
    %c0_32 = arith.constant 0 : index
    %c32 = arith.constant 32 : index
    %61 = vector.load %arg10[%c0_32, %c32] : memref<16x128xf32, #tpu.memory_space<vmem>>, vector<16x32xf32>
    tpu.vector_store %arg10[%c0_32, %c32], %56 {strides = array<i32>} : memref<16x128xf32, #tpu.memory_space<vmem>>, vector<16x32xf32>,
    %62 = arith.mulf %1, %56 : vector<16x32xf32>
    %c0_33 = arith.constant 0 : index
    %c64 = arith.constant 64 : index
    %63 = vector.load %arg10[%c0_33, %c64] : memref<16x128xf32, #tpu.memory_space<vmem>>, vector<16x32xf32>
    tpu.vector_store %arg10[%c0_33, %c64], %62 {strides = array<i32>} : memref<16x128xf32, #tpu.memory_space<vmem>>, vector<16x32xf32>,
    %64 = arith.mulf %1, %59 : vector<16x32xf32>
    %c0_34 = arith.constant 0 : index
    %c96 = arith.constant 96 : index
    %65 = vector.load %arg10[%c0_34, %c96] : memref<16x128xf32, #tpu.memory_space<vmem>>, vector<16x32xf32>
    tpu.vector_store %arg10[%c0_34, %c96], %64 {strides = array<i32>} : memref<16x128xf32, #tpu.memory_space<vmem>>, vector<16x32xf32>,
    %c0_35 = arith.constant 0 : index
    %c0_36 = arith.constant 0 : index
    %66 = vector.load %arg10[%c0_35, %c0_36] : memref<16x128xf32, #tpu.memory_space<vmem>>, vector<16x128xf32>
    %c0_37 = arith.constant 0 : index
    %c0_38 = arith.constant 0 : index
    %67 = vector.load %arg8[%c0_37, %c0_38] : memref<128x32xf32, #tpu.memory_space<vmem>>, vector<128x32xf32>
    %cst_39 = arith.constant dense<0.000000e+00> : vector<16x32xf32>
    %68 = tpu.matmul %66, %67, %cst_39 {dimension_numbers = #tpu.dot_dimension_numbers<[1], [0], [0], [1], [0, 0, 1, 1], [], []>, precision = #tpu.contract_precision<fp32>} : vector<16x128xf32>, vector<128x32xf32>, vector<16x32xf32> -> vector<16x32xf32>
    %c0_40 = arith.constant 0 : index
    %c0_41 = arith.constant 0 : index
    %c0_42 = arith.constant 0 : index
    %69 = vector.load %arg9[%c0_40, %c0_41, %c0_42] : memref<1x16x32xf32, #tpu.memory_space<vmem>>, vector<1x16x32xf32>
    %70 = vector.shape_cast %69 : vector<1x16x32xf32> to vector<16x32xf32>
    %71 = vector.shape_cast %68 : vector<16x32xf32> to vector<1x16x32xf32>
    tpu.vector_store %arg9[%c0_40, %c0_41, %c0_42], %71 {strides = array<i32>} : memref<1x16x32xf32, #tpu.memory_space<vmem>>, vector<1x16x32xf32>,
    return
  }
  func.func @transform_0(%arg0: i32) -> (i32, i32, i32) {
    %c0_i32 = arith.constant 0 : i32
    %c0_i32_0 = arith.constant 0 : i32
    %c0_i32_1 = arith.constant 0 : i32
    return %arg0, %c0_i32, %c0_i32_0 : i32, i32, i32
  }
  func.func @transform_1(%arg0: i32) -> (i32, i32, i32) {
    %c0_i32 = arith.constant 0 : i32
    %c0_i32_0 = arith.constant 0 : i32
    %c0_i32_1 = arith.constant 0 : i32
    return %arg0, %c0_i32, %c0_i32_0 : i32, i32, i32
  }
  func.func @transform_2(%arg0: i32) -> (i32, i32, i32) {
    %c0_i32 = arith.constant 0 : i32
    %c0_i32_0 = arith.constant 0 : i32
    %c0_i32_1 = arith.constant 0 : i32
    return %arg0, %c0_i32, %c0_i32_0 : i32, i32, i32
  }
  func.func @transform_3(%arg0: i32) -> (i32, i32, i32) {
    %c0_i32 = arith.constant 0 : i32
    %c0_i32_0 = arith.constant 0 : i32
    %c0_i32_1 = arith.constant 0 : i32
    return %arg0, %c0_i32, %c0_i32_0 : i32, i32, i32
  }
  func.func @transform_4(%arg0: i32) -> (i32, i32) {
    %c0_i32 = arith.constant 0 : i32
    %c0_i32_0 = arith.constant 0 : i32
    %c0_i32_1 = arith.constant 0 : i32
    return %c0_i32, %c0_i32_0 : i32, i32
  }
  func.func @transform_5(%arg0: i32) -> (i32, i32) {
    %c0_i32 = arith.constant 0 : i32
    %c0_i32_0 = arith.constant 0 : i32
    %c0_i32_1 = arith.constant 0 : i32
    return %c0_i32, %c0_i32_0 : i32, i32
  }
  func.func @transform_6(%arg0: i32) -> (i32, i32) {
    %c0_i32 = arith.constant 0 : i32
    %c0_i32_0 = arith.constant 0 : i32
    %c0_i32_1 = arith.constant 0 : i32
    return %c0_i32, %c0_i32_0 : i32, i32
  }
  func.func @transform_7(%arg0: i32) -> (i32, i32) {
    %c0_i32 = arith.constant 0 : i32
    %c0_i32_0 = arith.constant 0 : i32
    %c0_i32_1 = arith.constant 0 : i32
    return %c0_i32, %c0_i32_0 : i32, i32
  }
  func.func @transform_8(%arg0: i32) -> (i32, i32, i32) {
    %c0_i32 = arith.constant 0 : i32
    %c0_i32_0 = arith.constant 0 : i32
    %c0_i32_1 = arith.constant 0 : i32
    return %arg0, %c0_i32, %c0_i32_0 : i32, i32, i32
  }
}

</mosaic_0001>

<bundles_post_ra>
// kernel: tpu_custom_call.1
= control target key start
LH: loop header
LB: loop body
LE: loop exit
PB: predicated region body
PF: predicated region fallthrough
CT: control target
= control target key end

     0   :  { %13 = vsyncpa [#allocation4], 0  ;;  %s2644_s0 = inlined_call_operand.vmem [shape: f32[2,16,32], index: 0, kind: input, shape index: {}]   ;;  %s2645_s1 = inlined_call_operand.vmem [shape: f32[2,8,32], index: 1, kind: input, shape index: {}]   ;;  %s2646_s2 = inlined_call_operand.vmem [shape: f32[2,16,1], index: 2, kind: input, shape index: {}]   ;;  %s2647_s3 = inlined_call_operand.vmem [shape: f32[2,1,8], index: 3, kind: input, shape index: {}]   ;;  %s2648_s4 = inlined_call_operand.vmem [shape: f32[1,32], index: 4, kind: input, shape index: {}]   ;;  %s2649_s5 = inlined_call_operand.vmem [shape: f32[1,32], index: 5, kind: input, shape index: {}]   ;;  %s2650_s6 = inlined_call_operand.vmem [shape: f32[1,32], index: 6, kind: input, shape index: {}]   ;;  %s2651_s7 = inlined_call_operand.vmem [shape: f32[128,32], index: 7, kind: input, shape index: {}]   ;;  %s2652_s8 = inlined_call_operand.hbm [shape: f32[2,16,32], index: 8, kind: output, shape index: {}]  }
   0x1   :  { %15 = vsyncpa [#allocation4 + $0x1], 0  ;;  %s2126_s27 = smov 0   ;;  %s2128_s28 = smov 0  }
   0x2   :  { %s2130_s29 = smov 0   ;;  %s2132_s30 = smov 0  }
   0x3 LB: > { %s2147_s9 = sadd.s32 4294967295, %s2073_s30   ;;  %s1929_s10 = sadd.s32 4294967294, %s2073_s30   ;;  %s2073_s30 = sphi %s2132_s30, %s2660_s30   ;;  %s2069_s29 = sphi %s2130_s29, %s2659_s29   ;;  %s2065_s28 = sphi %s2128_s28, %s2658_s28   ;;  %s2061_s27 = sphi %s2126_s27, %s2657_s27  }
   0x4   : > { %s2151_s11 = sadd.s32 1, %s2073_s30   ;;  %s216_s12 = sadd.s32 1, %s2069_s29 }
   0x5   : > { %s213_s13 = ssub.s32 %s2073_s30, %s2151_s11  ;;  %p226_p0 = scmp.ne.s32.totalorder %s2069_s29, %s2065_s28 }
   0x6   : > { %p214_p1 = scmp.eq.s32.totalorder %s213_s13, 0  ;;  %p227_p2 = scmp.eq.s32.totalorder %s2147_s9, 1 }
   0x7   : > { %p232_p3 = scmp.ne.s32.totalorder %s2065_s28, %s2061_s27  ;;  %p233_p4 = scmp.eq.s32.totalorder %s1929_s10, 1 }
   0x8   : > { %s2162_s14 = scalar_select %p214_p1, %s2069_s29, %s216_s12  }
   0x9   : > { %p2164_p5 = por %p227_p2, %p226_p0  ;;  %p2168_p6 = por %p233_p4, %p232_p3 }
   0xa   : > { %p1932_p7 = scmp.ge.s32.totalorder %s2073_s30, 1  ;;  %p292_p8 = scmp.lt.s32.totalorder %s2073_s30, 3 }
   0xc   : > { %p293_p9 = pnand %p1932_p7, %p292_p8 }
   0xd   : > { %p338_p10 = scmp.lt.s32.totalorder (!%p293_p9), %s2147_s9, 1  ;;  %s2077_s26 = smov (!%p293_p9), 64  }
   0xe   : > { %296 = sbr.rel (%p293_p9) target bundleno = 1031 (0x407), region = 52  ;;  %s335_s22 = sand.u32 (!%p293_p9), 1, %s2065_s28  }
   0xf   : > { %s1933_s23 = sshll.u32 (!%p293_p9), %s335_s22, 4 }
  0x13   : > { %s2176_s17 = scalar_select %p338_p10, %s2147_s9, 1  ;;  %v1995_v0 = vld [vmem:[%s2650_s6] ss:$0 sm:$0xff]  ;;  %vm369_vm0 = vcmask 261120   ;;  %v2075_v24 = vmov 0   ;;  %vm732_vm4 = vcmask 64512  }
  0x14   : > { %v1996_v26 = vld [vmem:[%s2648_s4] ss:$0 sm:$0xff]  ;;  %1993 = vset.pattern.permute.xlu1 %v2075_v24  ;;  %1994 = vset.pattern.permute.xlu0 %v2075_v24  ;;  %vm860_vm12 = vcmask 130048  }
  0x15   : > { %s1936_s20 = sshll.u32 %s2176_s17, 3  ;;  %s1944_s21 = sshll.u32 %s2176_s17, 4  ;;  %v362_v27 = vld [vmem:[%s2649_s5] sm:$0x1] }
  0x16   : > { %s346_s24 = scalar_lea.vmem %s2645_s1, %s1936_s20  ;;  %s342_s10 = scalar_lea.vmem %s2644_s0, %s1944_s21  ;;  %v568_v31 = vsel %vm369_vm0, %v362_v27, 0 }
  0x17   : > { %v2191_v1 = vld [vmem:[%s346_s24] sm:$0xff]  ;;  %v2195_v3 = vld [vmem:[%s342_s10 + $0x8] sm:$0xff]  ;;  %s351_s18 = scalar_lea.vmem %s2646_s2, %s1944_s21  ;;  %v587_v33 = vand.u32 4294901760, %v568_v31  ;;  %s354_s25 = scalar_lea.vmem %s2647_s3, %s2176_s17 }
  0x18   : > { %v2193_v2 = vld [vmem:[%s342_s10] sm:$0xff]  ;;  %v377_v4 = vsel %vm369_vm0, %v2191_v1, 0  ;;  %v368_v6 = vmul.f32 %v1995_v0, %v2195_v3  ;;  %1388 = vst.msk [vmem:[#allocation2 + $0x8] sm:$0xff] %vm369_vm0, %v2195_v3  ;;  %v359_v32 = vld [vmem:[%s351_s18 + $0x8] sm:$0xff]  ;;  %v560_v35 = vmul.f32 %v1996_v26, %v2195_v3  ;;  %s2076_s17 = smov 32   ;;  %s2078_s21 = smov 96  }
  0x19   : > { %v367_v5 = vmul.f32 %v1995_v0, %v2193_v2  ;;  %1387 = vst.msk [vmem:[#allocation2] sm:$0xff] %vm369_vm0, %v2193_v2  ;;  %v2203_v7 = vand.u32 4294901760, %v377_v4  ;;  %v358_v22 = vld [vmem:[%s351_s18] sm:$0xff]  ;;  %v559_v28 = vmul.f32 %v1996_v26, %v2193_v2  ;;  %vm717_vm2 = vcmp.gt.f32.partialorder %v359_v32, 0.0  ;;  %s1946_s24 = sshll.u32 %s2147_s9, 4  ;;  %s337_s10 = scalar_lea.vmem [#allocation3], %s1933_s23 }
  0x1a   : > { %v374_v9 = vsel %vm369_vm0, %v368_v6, 0  ;;  %vm716_vm1 = vcmp.gt.f32.partialorder %v358_v22, 0.0  ;;  %v721_v34 = vsel %vm717_vm2, 1, %v2075_v24  ;;  %v564_v36 = vsel %vm369_vm0, %v560_v35, 0.0  ;;  %s1831_s12 = sshll.u32 %s337_s10, 4  ;;  %s1819_s9 = scalar_lea.sflag [#allocation4], %s335_s22  ;;  %s1832_s12 = int_to_ptr.vmem [resolvable:$true] %s1831_s12 }
  0x1b   : > { %v371_v8 = vsel %vm369_vm0, %v367_v5, 0  ;;  %395 = vmatpush.xpose.msra.mxu2 %v2203_v7  ;;  %v429_v10 = vsub.f32 %v377_v4, %v2203_v7  ;;  %v404_v12 = vand.u32 4294901760, %v374_v9  ;;  %546 = vmatpush.xpose.msra.mxu1 %v2203_v7  ;;  %v720_v25 = vsel %vm716_vm1, 1, %v2075_v24  ;;  %s2031_s23 = scalar_lea.hbm %s2652_s8, 32 }
  0x1c   : > { %v396_v11 = vand.u32 4294901760, %v371_v8  ;;  %723 = vperm.xlu1 %1993, %v720_v25   ;;  %v561_v30 = vsel %vm369_vm0, %v559_v28, 0.0  ;;  %v588_v37 = vsub.f32 %v568_v31, %v587_v33 }
  0x1d   : > { %v430_v13 = vand.u32 4294901760, %v429_v10  ;;  %v405_v15 = vsub.f32 %v374_v9, %v404_v12  ;;  %562 = vadd.xlane.f32.xlu0 %v561_v30 }
  0x1e   : > { %v397_v14 = vsub.f32 %v371_v8, %v396_v11  ;;  %548 = vmatmul.f32.vlgmr.msra.gmra.mxu1 %v396_v11  ;;  %v589_v38 = vand.u32 4294901760, %v588_v37 }
  0x1f   : > { %710 = vmatpush.xpose.msrb.mxu1 %v2203_v7  ;;  %460 = vmatpush.xpose.msrb.mxu2 %v429_v10  ;;  %v431_v16 = vsub.f32 %v429_v10, %v430_v13  ;;  %v406_v20 = vand.u32 4294901760, %v405_v15 }
  0x20   : > { %v398_v17 = vand.u32 4294901760, %v397_v14  ;;  %520 = vmatpush.xpose.msra.mxu0 %v430_v13  ;;  %v590_v39 = vsub.f32 %v588_v37, %v589_v38 }
  0x21   : > { %v432_v18 = vand.u32 4294901760, %v431_v16  ;;  %v407_v23 = vsub.f32 %v405_v15, %v406_v20  ;;  %v360_v16 = vld [vmem:[%s354_s25] sm:$0x1] }
  0x22   : > { %v399_v19 = vsub.f32 %v397_v14, %v398_v17  ;;  %v591_v40 = vand.u32 4294901760, %v590_v39  ;;  %vm773_vm6 = vcmp.gt.f32.partialorder %v360_v16, 0.0  ;;  %v880_v16 = vand.u32 4294901760, %v2193_v2 }
  0x23   : > { %522 = vmatmul.f32.vlgmr.msra.gmra.mxu0 %v396_v11  ;;  %433 = vmatpush.xpose.msra.mxu3 %v432_v18  ;;  %v408_v29 = vand.u32 4294901760, %v407_v23  ;;  %v777_v26 = vsel %vm773_vm6, 1, %v2075_v24  ;;  %vm1397_vm6 = vcmask 523520  }
  0x24   : > { %688 = vmatpush.xpose.msrb.mxu0 %v430_v13  ;;  %v400_v21 = vand.u32 4294901760, %v399_v19  ;;  %726 = vperm.xlu1 %1993, %v721_v34   ;;  %v778_v30 = vperm.slane %v777_v26, 0 }
  0x25   : > { %565 = vadd.xlane.f32.xlu0 %v564_v36 }
  0x26   : > { %401 = vmatmul.f32.vlgmr.msra.gmra.mxu2 %v400_v21  ;;  %435 = vmatmul.f32.vlgmr.msra.gmra.mxu3 %v396_v11  ;;  %vm779_vm7 = vcmp.eq.s32.totalorder %v778_v30, 1 }
  0x27   : > { %488 = vmatpush.xpose.msrb.mxu3 %v2203_v7  ;;  %586 = vmatpush.xpose.msra.mxu2 %v2203_v7 }
  0x28   : > { %552 = vmatmul.f32.gmra.mxu1 %v404_v12 }
  0x2b   : > { %616 = vmatpush.xpose.msra.mxu3 %v432_v18  ;;  %526 = vmatmul.f32.gmra.mxu0 %v404_v12 }
  0x2e   : > { %409 = vmatmul.f32.gmra.mxu2 %v408_v29  ;;  %439 = vmatmul.f32.gmra.mxu3 %v404_v12 }
  0x30   : > { %712 = vmatmul.f32.vlgmr.msrb.gmra.mxu1 %v587_v33 }
  0x33   : > { %690 = vmatmul.f32.vlgmr.msrb.gmra.mxu0 %v587_v33 }
  0x36   : > { %463 = vmatmul.f32.vlgmr.msrb.gmra.mxu2 %v397_v14  ;;  %492 = vmatmul.f32.vlgmr.msrb.gmra.mxu3 %v398_v17 }
  0x37   : > { %639 = vmatpush.xpose.msrb.mxu2 %v429_v10  ;;  %662 = vmatpush.xpose.msrb.mxu3 %v2203_v7 }
  0x3e   : > { %468 = vmatmul.f32.gmra.mxu2 %v405_v15  ;;  %498 = vmatmul.f32.gmra.mxu3 %v406_v20 }
  0x46   : > { %592 = vmatmul.f32.vlgmr.msra.gmra.mxu2 %v591_v40  ;;  %618 = vmatmul.f32.vlgmr.msra.gmra.mxu3 %v587_v33 }
  0x4e   : > { %642 = vmatmul.f32.vlgmr.msrb.gmra.mxu2 %v588_v37  ;;  %666 = vmatmul.f32.vlgmr.msrb.gmra.mxu3 %v589_v38 }
  0x8e   : > { %v724_v53 = vpop.permute.xlu1 %723 }
  0x8f   : > { %vm728_vm3 = vcmp.eq.s32.totalorder %v724_v53, 1 }
  0x90   : > { %v563_v52 = vpop.xlane.xlu0 %562 }
  0x96   : > { %v727_v5 = vpop.permute.xlu1 %726 }
  0x97   : > { %vm729_vm5 = vcmp.eq.s32.totalorder %v727_v5, 1 }
  0x98   : > { %v566_v4 = vpop.xlane.xlu0 %565 }
  0x9b   : > { %v549_v50 = vpop.f32.mrf.mxu1 }
  0xa0   : > { %v523_v47 = vpop.f32.mrf.mxu0 }
  0xa5   : > { %v553_v62 = vpop.f32.mrf.mxu1 }
  0xa8   : > { %v527_v60 = vpop.f32.mrf.mxu0 }
  0xa9   : > { %v402_v41 = vpop.f32.mrf.mxu2  ;;  %v436_v42 = vpop.f32.mrf.mxu3 }
  0xaa   : > { %v437_v45 = vadd.f32 %v436_v42, %v402_v41 }
  0xad   : > { %v713_v27 = vpop.f32.mrf.mxu1 }
  0xb0   : > { %v691_v22 = vpop.f32.mrf.mxu0 }
  0xb1   : > { %v410_v43 = vpop.f32.mrf.mxu2  ;;  %v440_v44 = vpop.f32.mrf.mxu3 }
  0xb2   : > { %v441_v55 = vadd.f32 %v440_v44, %v410_v43 }
  0xb9   : > { %v464_v46 = vpop.f32.mrf.mxu2  ;;  %v493_v49 = vpop.f32.mrf.mxu3 }
  0xba   : > { %v465_v48 = vadd.f32 %v464_v46, %v437_v45 }
  0xbc   : > { %v494_v51 = vadd.f32 %v493_v49, %v465_v48 }
  0xbe   : > { %v524_v54 = vadd.f32 %v523_v47, %v494_v51 }
  0xc0   : > { %v550_v57 = vadd.f32 %v549_v50, %v524_v54 }
  0xc1   : > { %v469_v56 = vpop.f32.mrf.mxu2  ;;  %v499_v59 = vpop.f32.mrf.mxu3 }
  0xc2   : > { %v470_v58 = vadd.f32 %v469_v56, %v441_v55  ;;  %v718_v63 = vadd.f32 %v563_v52, %v550_v57 }
  0xc4   : > { %v500_v61 = vadd.f32 %v499_v59, %v470_v58  ;;  %v730_v8 = vsel %vm728_vm3, %v718_v63, -1e+30 }
  0xc5   : > { %v733_v12 = vsel %vm732_vm4, %v730_v8, -inf }
  0xc6   : > { %v528_v0 = vadd.f32 %v527_v60, %v500_v61 }
  0xc8   : > { %v554_v6 = vadd.f32 %v553_v62, %v528_v0 }
  0xc9   : > { %v593_v7 = vpop.f32.mrf.mxu2  ;;  %v619_v10 = vpop.f32.mrf.mxu3 }
  0xca   : > { %v719_v9 = vadd.f32 %v566_v4, %v554_v6  ;;  %v620_v15 = vadd.f32 %v619_v10, %v593_v7 }
  0xcc   : > { %v731_v11 = vsel %vm729_vm5, %v719_v9, -1e+30 }
  0xcd   : > { %v734_v13 = vsel %vm732_vm4, %v731_v11, -inf }
  0xce   : > { %v735_v14 = vmax.f32 %v733_v12, %v734_v13 }
  0xd0   : > { %v736_v17 = vrot.slane %v735_v14, 4 }
  0xd1   : > { %v643_v18 = vpop.f32.mrf.mxu2  ;;  %v667_v21 = vpop.f32.mrf.mxu3 }
  0xd2   : > { %v737_v19 = vmax.f32 %v735_v14, %v736_v17  ;;  %v644_v20 = vadd.f32 %v643_v18, %v620_v15  ;;  %v878_v14 = vand.u32 4294901760, %v2195_v3  ;;  %v912_v18 = vsub.f32 %v2193_v2, %v880_v16 }
  0xd4   : > { %v738_v23 = vrot.slane %v737_v19, 2  ;;  %v668_v25 = vadd.f32 %v667_v21, %v644_v20  ;;  %v906_v15 = vsub.f32 %v2195_v3, %v878_v14  ;;  %963 = vmatpush.msra.mxu1 %v878_v14  ;;  %879 = vmatpush.msra.mxu2 %v878_v14  ;;  %v913_v21 = vand.u32 4294901760, %v912_v18 }
  0xd6   : > { %v739_v28 = vmax.f32 %v737_v19, %v738_v23  ;;  %v692_v29 = vadd.f32 %v691_v22, %v668_v25  ;;  %v907_v17 = vand.u32 4294901760, %v906_v15  ;;  %938 = vmatpush.msra.mxu0 %v906_v15  ;;  %965 = vmatpush.msra.mxu1 %v880_v16  ;;  %v914_v25 = vsub.f32 %v912_v18, %v913_v21 }
  0xd7   : > { %881 = vmatpush.msra.mxu2 %v880_v16 }
  0xd8   : > { %v740_v31 = vrot.slane %v739_v28, 1  ;;  %v714_v32 = vadd.f32 %v713_v27, %v692_v29  ;;  %v908_v20 = vsub.f32 %v906_v15, %v907_v17  ;;  %941 = vmatpush.msra.mxu0 %v912_v18  ;;  %v915_v26 = vand.u32 4294901760, %v914_v25 }
  0xd9   : > { %990 = vmatpush.msrb.mxu2 %v907_v17  ;;  %v1044_v27 = vand.u32 4294901760, %v2191_v1 }
  0xda   : > { %v741_v33 = vmax.f32 %v739_v28, %v740_v31  ;;  %v774_v34 = vperm.slane %v714_v32, 0  ;;  %v909_v23 = vand.u32 4294901760, %v908_v20 }
  0xdb   : > { %994 = vmatpush.msrb.mxu2 %v913_v21  ;;  %1045 = vmatpush.msrb.mxu0 %v1044_v27  ;;  %v1079_v28 = vsub.f32 %v2191_v1, %v1044_v27 }
  0xdc   : > { %v742_v35 = vsub.f32 %v730_v8, %v741_v33  ;;  %v743_v36 = vsub.f32 %v731_v11, %v741_v33  ;;  %v775_v37 = vadd.f32 %v774_v34, %v550_v57  ;;  %v776_v38 = vadd.f32 %v774_v34, %v554_v6  ;;  %910 = vmatpush.msra.mxu3 %v909_v23 }
  0xdd   : > { %v1080_v29 = vand.u32 4294901760, %v1079_v28 }
  0xde   : > { %v746_v39 = vmul.f32 1.442695, %v743_v36  ;;  %v780_v40 = vsel %vm779_vm7, %v775_v37, -1e+30  ;;  %v781_v41 = vsel %vm779_vm7, %v776_v38, -1e+30  ;;  %916 = vmatpush.msra.mxu3 %v915_v26 }
  0xdf   : > { %v782_v42 = vsel %vm732_vm4, %v780_v40, -inf  ;;  %v785_v24 = vsel %vm732_vm4, %v781_v41, -inf  ;;  %v744_v43 = vmul.f32 1.442695, %v742_v35  ;;  %v1081_v30 = vsub.f32 %v1079_v28, %v1080_v29 }
  0xe0   : > { %1997 = vpow2.f32 %v746_v39  ;;  %783 = vmax.xlane.f32.xlu0 %v782_v42  ;;  %786 = vmax.xlane.f32.xlu1 %v785_v24  ;;  %vm1410_vm7 = vcmask 785920  }
  0xe1   : > { %1999 = vpow2.f32 %v744_v43  ;;  %1015 = vmatpush.msrb.mxu3 %v878_v14  ;;  %v1082_v31 = vand.u32 4294901760, %v1081_v30 }
  0xe3   : > { %1017 = vmatpush.msrb.mxu3 %v880_v16  ;;  %1083 = vmatpush.msrb.mxu1 %v1082_v31 }
  0xe6   : > { %v1998_v44 = vpop.eup %1997 }
  0xe7   : > { %v2000_v45 = vpop.eup %1999  ;;  %v749_v46 = vsel %vm732_vm4, %v1998_v44, 0.0 }
  0xe8   : > { %v748_v47 = vsel %vm732_vm4, %v2000_v45, 0.0 }
  0xe9   : > { %v750_v48 = vadd.f32 %v749_v46, %v748_v47 }
  0xeb   : > { %v751_v49 = vrot.slane %v750_v48, 4 }
  0xed   : > { %v752_v50 = vadd.f32 %v751_v49, %v750_v48 }
  0xef   : > { %v753_v51 = vrot.slane %v752_v50, 2 }
  0xf1   : > { %v754_v52 = vadd.f32 %v753_v51, %v752_v50 }
  0xf3   : > { %v755_v53 = vrot.slane %v754_v52, 1 }
  0xf5   : > { %v756_v54 = vadd.f32 %v755_v53, %v754_v52 }
  0xf7   : > { %2001 = vrcp.f32 %v756_v54  ;;  %v768_v58 = vand.u32 2147483648, %v756_v54  ;;  %v766_v60 = vand.u32 2147483647, %v756_v54  ;;  %vm762_vm9 = vweird.f32 %v756_v54 }
  0xf9   : > { %v769_v62 = vor.u32 1.1754944e-38, %v768_v58  ;;  %vm767_vm11 = vcmp.eq.f32.partialorder %v766_v60, 8.507059e+37 }
  0xfd   : > { %v2002_v55 = vpop.eup %2001 }
  0xfe   : > { %v758_v56 = vmul.f32 %v2002_v55, %v756_v54  ;;  %vm763_vm8 = vweird.f32 %v2002_v55 }
  0xff   : > { %vm764_vm10 = vmor %vm762_vm9, %vm763_vm8  ;;  %vm1423_vm8 = vcmask 1048320  }
 0x100   : > { %v759_v57 = vsub.f32 1.0, %v758_v56 }
 0x102   : > { %v760_v59 = vmul.f32 %v2002_v55, %v759_v57 }
 0x104   : > { %v761_v61 = vadd.f32 %v2002_v55, %v760_v59 }
 0x106   : > { %v765_v63 = vsel %vm764_vm10, %v2002_v55, %v761_v61 }
 0x107   : > { %v770_v0 = vsel %vm767_vm11, %v769_v62, %v765_v63 }
 0x108   : > { %v771_v4 = vmul.f32 %v2000_v45, %v770_v0  ;;  %v772_v5 = vmul.f32 %v1998_v44, %v770_v0 }
 0x10a   : > { %828 = vxpose.xlu2.b32.start [1/2] (short) (narrow) %v771_v4, 8 }
 0x112   : > { %829 = vxpose.xlu2.b32.end [2/2] (short) (narrow) %v772_v5, 8 }
 0x153   : > { %v787_v6 = vpop.xlane.xlu1 %786  ;;  %v784_v11 = vpop.xlane.xlu0 %783 }
 0x154   : > { %v789_v7 = vsub.f32 %v781_v41, %v787_v6  ;;  %v788_v12 = vsub.f32 %v780_v40, %v784_v11 }
 0x156   : > { %v792_v8 = vmul.f32 1.442695, %v789_v7  ;;  %v790_v13 = vmul.f32 1.442695, %v788_v12 }
 0x158   : > { %2003 = vpow2.f32 %v792_v8 }
 0x159   : > { %2005 = vpow2.f32 %v790_v13 }
 0x15e   : > { %v2004_v9 = vpop.eup %2003 }
 0x15f   : > { %v797_v10 = vsel %vm732_vm4, %v2004_v9, 0.0  ;;  %v2006_v19 = vpop.eup %2005  ;;  %v1027_v36 = vsel %vm732_vm4, %v2004_v9, 0 }
 0x160   : > { %798 = vadd.xlane.f32.xlu0 %v797_v10  ;;  %v794_v22 = vsel %vm732_vm4, %v2006_v19, 0.0  ;;  %v1024_v32 = vsel %vm732_vm4, %v2006_v19, 0  ;;  %v2262_v39 = vand.u32 4294901760, %v1027_v36 }
 0x161   : > { %v2256_v33 = vand.u32 4294901760, %v1024_v32 }
 0x162   : > { %v2266_v42 = vsub.f32 %v1027_v36, %v2262_v39 }
 0x163   : > { %v2259_v34 = vsub.f32 %v1024_v32, %v2256_v33 }
 0x164   : > { %v2270_v46 = vand.u32 4294901760, %v2266_v42 }
 0x165   : > { %v1048_v40 = vand.u32 4294901760, %v2259_v34 }
 0x166   : > { %v1057_v47 = vsub.f32 %v2266_v42, %v2270_v46 }
 0x167   : > { %v1049_v43 = vsub.f32 %v2259_v34, %v1048_v40 }
 0x168   : > { %v2275_v48 = vand.u32 4294901760, %v1057_v47 }
 0x169   : > { %v1050_v45 = vand.u32 4294901760, %v1049_v43 }
 0x183   : > { %795 = vadd.xlane.f32.xlu2 %v794_v22 }
 0x1a3   : > { %v844_v35 = vpop.trf.xlu2 }
 0x1a4   : > { %v862_v37 = vsel %vm860_vm12, %v844_v35, 0 }
 0x1a5   : > { %v882_v38 = vand.u32 4294901760, %v862_v37 }
 0x1a7   : > { %v883_v1 = vsub.f32 %v862_v37, %v882_v38  ;;  %918 = vmatmul.f32.vlgmr.msra.gmra.mxu3 %v882_v38 }
 0x1a8   : > { %1138 = vmatpush.msra.mxu3 %v1044_v27 }
 0x1a9   : > { %v884_v41 = vand.u32 4294901760, %v883_v1  ;;  %944 = vmatmul.f32.vlgmr.msra.gmra.mxu0 %v883_v1 }
 0x1aa   : > { %1170 = vmatpush.msra.mxu0 %v1080_v29 }
 0x1ab   : > { %v885_v24 = vsub.f32 %v883_v1, %v884_v41  ;;  %969 = vmatmul.f32.vlgmr.msra.gmra.mxu1 %v884_v41 }
 0x1ac   : > { %1196 = vmatpush.msra.mxu1 %v1044_v27 }
 0x1ad   : > { %v886_v44 = vand.u32 4294901760, %v885_v24 }
 0x1af   : > { %887 = vmatmul.f32.vlgmr.msra.gmra.mxu2 %v886_v44  ;;  %1019 = vmatmul.f32.vlgmr.msrb.gmra.mxu3 %v882_v38 }
 0x1b0   : > { %1110 = vmatpush.msra.mxu2 %v1079_v28 }
 0x1b1   : > { %1051 = vmatmul.f32.vlgmr.msrb.gmra.mxu0 %v1050_v45 }
 0x1b3   : > { %1085 = vmatmul.f32.vlgmr.msrb.gmra.mxu1 %v2256_v33 }
 0x1b7   : > { %996 = vmatmul.f32.vlgmr.msrb.gmra.mxu2 %v882_v38  ;;  %1142 = vmatmul.f32.vlgmr.msra.gmra.mxu3 %v1048_v40 }
 0x1b9   : > { %1059 = vmatmul.f32.gmra.mxu0 %v2275_v48 }
 0x1bb   : > { %1089 = vmatmul.f32.gmra.mxu1 %v2262_v39 }
 0x1bf   : > { %1113 = vmatmul.f32.vlgmr.msra.gmra.mxu2 %v2259_v34  ;;  %1148 = vmatmul.f32.gmra.mxu3 %v2270_v46 }
 0x1c1   : > { %1172 = vmatmul.f32.vlgmr.msra.gmra.mxu0 %v2256_v33 }
 0x1c3   : > { %1198 = vmatmul.f32.vlgmr.msra.gmra.mxu1 %v2256_v33 }
 0x1c7   : > { %1118 = vmatmul.f32.gmra.mxu2 %v2266_v42 }
 0x1c9   : > { %1176 = vmatmul.f32.gmra.mxu0 %v2262_v39 }
 0x1cb   : > { %1202 = vmatmul.f32.gmra.mxu1 %v2262_v39 }
 0x1d3   : > { %v2286_v63 = vpop.xlane.xlu0 %798 }
 0x1d4   : > { %vm819_vm3 = vweird.f32 %v2286_v63 }
 0x1f6   : > { %v796_v51 = vpop.xlane.xlu2 %795 }
 0x1f7   : > { %2007 = vrcp.f32 %v796_v51  ;;  %v811_v17 = vand.u32 2147483648, %v796_v51  ;;  %vm805_vm14 = vweird.f32 %v796_v51  ;;  %v809_v19 = vand.u32 2147483647, %v796_v51 }
 0x1f8   : > { %2009 = vrcp.f32 %v2286_v63 }
 0x1f9   : > { %v812_v29 = vor.u32 1.1754944e-38, %v811_v17  ;;  %vm810_vm1 = vcmp.eq.f32.partialorder %v809_v19, 8.507059e+37 }
 0x1fd   : > { %v2008_v56 = vpop.eup %2007 }
 0x1fe   : > { %v801_v59 = vmul.f32 %v2008_v56, %v796_v51  ;;  %vm806_vm13 = vweird.f32 %v2008_v56  ;;  %v2010_v16 = vpop.eup %2009 }
 0x1ff   : > { %vm2290_vm15 = vmor %vm805_vm14, %vm806_vm13  ;;  %v815_v25 = vmul.f32 %v2010_v16, %v2286_v63  ;;  %vm820_vm2 = vweird.f32 %v2010_v16 }
 0x200   : > { %v802_v0 = vsub.f32 1.0, %v801_v59  ;;  %vm821_vm4 = vmor %vm819_vm3, %vm820_vm2 }
 0x201   : > { %v816_v36 = vsub.f32 1.0, %v815_v25 }
 0x202   : > { %v803_v8 = vmul.f32 %v2008_v56, %v802_v0  ;;  %v1439_v0 = vld [vmem:[%s2651_s7 + $0x58] sm:$0xff] }
 0x204   : > { %v804_v13 = vadd.f32 %v2008_v56, %v803_v8  ;;  %v1437_v8 = vld [vmem:[%s2651_s7 + $0x48] sm:$0xff] }
 0x206   : > { %v808_v28 = vsel %vm2290_vm15, %v2008_v56, %v804_v13  ;;  %v2364_v13 = vand.u32 4294901760, %v1437_v8 }
 0x207   : > { %v2299_v35 = vsel %vm810_vm1, %v812_v29, %v808_v28 }
 0x226   : > { %v945_v49 = vpop.f32.mrf.mxu0 }
 0x228   : > { %v970_v50 = vpop.f32.mrf.mxu1 }
 0x22a   : > { %v919_v52 = vpop.f32.mrf.mxu3 }
 0x22e   : > { %v1052_v53 = vpop.f32.mrf.mxu0 }
 0x230   : > { %v1086_v57 = vpop.f32.mrf.mxu1 }
 0x231   : > { %v1087_v10 = vadd.f32 %v1086_v57, %v1052_v53  ;;  %v1441_v57 = vld [vmem:[%s2651_s7 + $0x68] sm:$0xff] }
 0x232   : > { %v888_v54 = vpop.f32.mrf.mxu2  ;;  %v1020_v61 = vpop.f32.mrf.mxu3 }
 0x233   : > { %v920_v55 = vadd.f32 %v919_v52, %v888_v54 }
 0x235   : > { %v946_v58 = vadd.f32 %v945_v49, %v920_v55 }
 0x236   : > { %v1060_v5 = vpop.f32.mrf.mxu0 }
 0x237   : > { %v971_v60 = vadd.f32 %v970_v50, %v946_v58 }
 0x238   : > { %v1090_v7 = vpop.f32.mrf.mxu1 }
 0x239   : > { %v1091_v31 = vadd.f32 %v1090_v7, %v1060_v5 }
 0x23a   : > { %v997_v62 = vpop.f32.mrf.mxu2  ;;  %v1143_v18 = vpop.f32.mrf.mxu3 }
 0x23b   : > { %v998_v4 = vadd.f32 %v997_v62, %v971_v60  ;;  %v2334_v62 = vand.u32 4294901760, %v1441_v57 }
 0x23d   : > { %v1021_v6 = vadd.f32 %v1020_v61, %v998_v4  ;;  %v1438_v4 = vld [vmem:[%s2651_s7 + $0x50] sm:$0xff] }
 0x23e   : > { %v1173_v23 = vpop.f32.mrf.mxu0  ;;  %v2349_v7 = vand.u32 4294901760, %v1438_v4 }
 0x23f   : > { %v1223_v9 = vand.u32 4294901760, %v1021_v6 }
 0x240   : > { %v1199_v30 = vpop.f32.mrf.mxu1 }
 0x241   : > { %v1258_v11 = vsub.f32 %v1021_v6, %v1223_v9  ;;  %1224 = vmatpush.msrb.mxu2 %v1223_v9  ;;  %1317 = vmatpush.msrb.mxu1 %v1223_v9  ;;  %v2347_v6 = vand.u32 4294901760, %v1439_v0 }
 0x242   : > { %v1114_v12 = vpop.f32.mrf.mxu2  ;;  %1230 = vmatmul.f32.vlgmr.msrb.gmra.mxu2 %v1050_v45  ;;  %1321 = vmatmul.f32.vlgmr.msrb.gmra.mxu1 %v1048_v40  ;;  %v1149_v1 = vpop.f32.mrf.mxu3  ;;  %v817_v40 = vmul.f32 %v2010_v16, %v816_v36 }
 0x243   : > { %v1115_v14 = vadd.f32 %v1114_v12, %v1087_v10  ;;  %1289 = vmatpush.msrb.mxu0 %v1258_v11  ;;  %v1259_v15 = vand.u32 4294901760, %v1258_v11  ;;  %v2361_v12 = vsub.f32 %v1441_v57, %v2334_v62  ;;  %v1430_v57 = vld [vmem:[%s2651_s7 + $0x10] sm:$0xff] }
 0x244   : > { %1292 = vmatmul.f32.vlgmr.msrb.gmra.mxu0 %v2259_v34  ;;  %v818_v45 = vadd.f32 %v2010_v16, %v817_v40  ;;  %v1433_v40 = vld [vmem:[%s2651_s7 + $0x28] sm:$0xff] }
 0x245   : > { %v1144_v20 = vadd.f32 %v1143_v18, %v1115_v14  ;;  %1349 = vmatpush.msra.mxu2 %v1259_v15  ;;  %v1260_v21 = vsub.f32 %v1258_v11, %v1259_v15  ;;  %v2372_v15 = vsub.f32 %v1439_v0, %v2347_v6  ;;  %v1507_v19 = vand.u32 4294901760, %v2361_v12 }
 0x246   : > { %v1177_v24 = vpop.f32.mrf.mxu0 }
 0x247   : > { %v1174_v26 = vadd.f32 %v1173_v23, %v1144_v20  ;;  %v1261_v27 = vand.u32 4294901760, %v1260_v21  ;;  %v1436_v20 = vld [vmem:[%s2651_s7 + $0x40] sm:$0xff]  ;;  %v2387_v23 = vsub.f32 %v1437_v8, %v2364_v13  ;;  %v1508_v28 = vsub.f32 %v2361_v12, %v1507_v19 }
 0x248   : > { %v1203_v47 = vpop.f32.mrf.mxu1  ;;  %v1519_v29 = vand.u32 4294901760, %v2372_v15 }
 0x249   : > { %1262 = vmatpush.msrb.mxu3 %v1261_v27  ;;  %v1200_v32 = vadd.f32 %v1199_v30, %v1174_v26 }
 0x24a   : > { %v1119_v34 = vpop.f32.mrf.mxu2  ;;  %1238 = vmatmul.f32.gmra.mxu2 %v2275_v48  ;;  %1264 = vmatmul.f32.vlgmr.msrb.gmra.mxu3 %v2256_v33  ;;  %v822_v48 = vsel %vm821_vm4, %v2010_v16, %v818_v45  ;;  %v2375_v16 = vsub.f32 %v1438_v4, %v2349_v7 }
 0x24b   : > { %v1120_v37 = vadd.f32 %v1119_v34, %v1091_v31  ;;  %1327 = vmatmul.f32.gmra.mxu1 %v2270_v46  ;;  %1375 = vmatpush.msra.mxu3 %v1223_v9  ;;  %v1206_v38 = vmul.f32 %v1200_v32, %v2299_v35  ;;  %v825_v46 = vand.u32 2147483648, %v2286_v63  ;;  %v2403_v31 = vand.u32 4294901760, %v1436_v20  ;;  %v1435_v32 = vld [vmem:[%s2651_s7 + $0x38] sm:$0xff] }
 0x24c   : > { %1297 = vmatmul.f32.gmra.mxu0 %v2266_v42  ;;  %v823_v42 = vand.u32 2147483647, %v2286_v63  ;;  %v1440_v63 = vld [vmem:[%s2651_s7 + $0x60] sm:$0xff]  ;;  %v1525_v30 = vand.u32 4294901760, %v2375_v16 }
 0x24d   : > { %1391 = vrot.lane.b32.xlu0 %v1206_v38, %s2076_s17  ;;  %v1150_v41 = vadd.f32 %v1149_v1, %v1120_v37  ;;  %v1400_v44 = vmul.f32 %v1206_v38, %v2193_v2  ;;  %v826_v50 = vor.u32 1.1754944e-38, %v825_v46  ;;  %v2345_v5 = vand.u32 4294901760, %v1440_v63  ;;  %v1434_v1 = vld [vmem:[%s2651_s7 + $0x30] sm:$0xff] }
 0x24e   : > { %vm824_vm5 = vcmp.eq.f32.partialorder %v823_v42, 8.507059e+37  ;;  %v1509_v42 = vand.u32 4294901760, %v1508_v28 }
 0x24f   : > { %v1178_v43 = vadd.f32 %v1177_v24, %v1150_v41  ;;  %v2312_v51 = vsel %vm824_vm5, %v826_v50, %v822_v48  ;;  %v2369_v14 = vsub.f32 %v1440_v63, %v2345_v5  ;;  %v2429_v48 = vsub.f32 %v1436_v20, %v2403_v31 }
 0x250   : > { %v1526_v50 = vsub.f32 %v2375_v16, %v1525_v30 }
 0x251   : > { %v1204_v49 = vadd.f32 %v1203_v47, %v1178_v43  ;;  %v1513_v22 = vand.u32 4294901760, %v2369_v14  ;;  %v1531_v43 = vand.u32 4294901760, %v2387_v23  ;;  %v1520_v47 = vsub.f32 %v2372_v15, %v1519_v29 }
 0x252   : > { %1268 = vmatmul.f32.gmra.mxu3 %v2262_v39  ;;  %1351 = vmatmul.f32.vlgmr.msra.gmra.mxu2 %v2256_v33 }
 0x253   : > { %v1207_v52 = vmul.f32 %v1204_v49, %v2312_v51  ;;  %v1514_v38 = vsub.f32 %v2369_v14, %v1513_v22  ;;  %v2432_v49 = vand.u32 4294901760, %v1435_v32  ;;  %v1532_v0 = vsub.f32 %v2387_v23, %v1531_v43 }
 0x254   : > { %v1521_v8 = vand.u32 4294901760, %v1520_v47 }
 0x255   : > { %1404 = vrot.lane.b32.xlu0 %v1400_v44, %s2077_s26  ;;  %v1401_v53 = vmul.f32 %v1207_v52, %v2195_v3  ;;  %v1432_v44 = vld [vmem:[%s2651_s7 + $0x20] sm:$0xff] }
 0x25a   : > { %1355 = vmatmul.f32.gmra.mxu2 %v2262_v39  ;;  %1377 = vmatmul.f32.vlgmr.msra.gmra.mxu3 %v2256_v33  ;;  %v1443_v33 = vld [vmem:[%s2651_s7 + $0x78] sm:$0xff] }
 0x25b   : > { %v2330_v60 = vand.u32 4294901760, %v1443_v33 }
 0x25d   : > { %1393 = vrot.lane.b32.xlu0 %v1207_v52, %s2076_s17  ;;  %v2355_v10 = vsub.f32 %v1443_v33, %v2330_v60  ;;  %1445 = vmatpush.msra.mxu0 %v2330_v60  ;;  %v2438_v52 = vand.u32 4294901760, %v1434_v1  ;;  %v2449_v33 = vsub.f32 %v1435_v32, %v2432_v49  ;;  %v1527_v32 = vand.u32 4294901760, %v1526_v50 }
 0x25e   : > { %1658 = vmatpush.msrb.mxu3 %v2330_v60 }
 0x25f   : > { %v1495_v17 = vand.u32 4294901760, %v2355_v10  ;;  %1600 = vmatpush.msrb.mxu2 %v2355_v10  ;;  %v2462_v4 = vsub.f32 %v1434_v1, %v2438_v52 }
 0x261   : > { %v1496_v26 = vsub.f32 %v2355_v10, %v1495_v17 }
 0x262   : > { %1381 = vmatmul.f32.gmra.mxu3 %v2262_v39  ;;  %v1442_v39 = vld [vmem:[%s2651_s7 + $0x70] sm:$0xff] }
 0x263   : > { %v2332_v61 = vand.u32 4294901760, %v1442_v39  ;;  %v1497_v36 = vand.u32 4294901760, %v1496_v26  ;;  %v1429_v26 = vld [vmem:[%s2651_s7 + $0x8] sm:$0xff] }
 0x265   : > { %1406 = vrot.lane.b32.xlu0 %v1401_v53, %s2077_s26  ;;  %v2358_v11 = vsub.f32 %v1442_v39, %v2332_v61  ;;  %1447 = vmatpush.msra.mxu0 %v2332_v61  ;;  %v2440_v53 = vand.u32 4294901760, %v1433_v40  ;;  %v2452_v39 = vand.u32 4294901760, %v1432_v44  ;;  %s1830_s26 = scalar_lea.hbm %s2652_s8, %s1946_s24 }
 0x266   : > { %1660 = vmatpush.msrb.mxu3 %v2332_v61  ;;  %1498 = vmatpush.msra.mxu1 %v1497_v36  ;;  %v1549_v36 = vand.u32 4294901760, %v2462_v4  ;;  %s1833_s13 = sshll.u32 %s1830_s26, 4  ;;  %s1834_s13 = int_to_ptr.hbm [resolvable:$true] %s1833_s13 }
 0x267   : > { %v1501_v18 = vand.u32 4294901760, %v2358_v11  ;;  %1449 = vmatpush.msra.mxu0 %v2334_v62  ;;  %1603 = vmatpush.msrb.mxu2 %v2358_v11  ;;  %v2468_v20 = vsub.f32 %v1433_v40, %v2440_v53  ;;  %v1533_v40 = vand.u32 4294901760, %v1532_v0  ;;  %s2025_s18 = sshra.s32 %s1834_s13, 4  ;;  %s2026_s18 = int_to_ptr.hbm [resolvable:$true] %s2025_s18 }
 0x268   : > { %1662 = vmatpush.msrb.mxu3 %v2334_v62  ;;  %s2027_s19 = scalar_lea.hbm %s2026_s18, 16  ;;  %p2032_p0 = scmp.lt.s32.totalorder %s2026_s18, %s2652_s8 }
 0x269   : > { %v1502_v27 = vsub.f32 %v2358_v11, %v1501_v18  ;;  %1451 = vmatpush.msra.mxu0 %v2345_v5  ;;  %1606 = vmatpush.msrb.mxu2 %v2361_v12  ;;  %p2028_p11 = scmp.ne.s32.totalorder %s2026_s18, %s2027_s19  ;;  %p2033_p1 = scmp.lt.s32.totalorder %s2031_s23, %s2027_s19 }
 0x26a   : > { %1664 = vmatpush.msrb.mxu3 %v2345_v5 }
 0x26b   : > { %v1503_v37 = vand.u32 4294901760, %v1502_v27  ;;  %1453 = vmatpush.msra.mxu0 %v2347_v6  ;;  %1609 = vmatpush.msrb.mxu2 %v2369_v14  ;;  %p2029_p12 = pnand %p2028_p11, %p2164_p5  ;;  %p2034_p2 = por %p2033_p1, %p2032_p0 }
 0x26c   : > { %1666 = vmatpush.msrb.mxu3 %v2347_v6 }
 0x26d   : > { %1504 = vmatpush.msra.mxu1 %v1503_v37  ;;  %1455 = vmatpush.msra.mxu0 %v2349_v7  ;;  %v2485_v37 = vsub.f32 %v1432_v44, %v2452_v39  ;;  %p2030_p13 = pneg %p2029_p12 }
 0x26e   : > { %1612 = vmatpush.msrb.mxu2 %v2372_v15  ;;  %1668 = vmatpush.msrb.mxu3 %v2349_v7 }
 0x26f   : > { %1510 = vmatpush.msra.mxu1 %v1509_v42  ;;  %1457 = vmatpush.msra.mxu0 %v2364_v13  ;;  %p2035_p3 = pnand %p2034_p2, %p2030_p13 }
 0x270   : > { %1615 = vmatpush.msrb.mxu2 %v2375_v16  ;;  %1670 = vmatpush.msrb.mxu3 %v2364_v13 }
 0x271   : > { %1459 = vmatpush.msra.mxu0 %v2403_v31 }
 0x272   : > { %1618 = vmatpush.msrb.mxu2 %v2387_v23  ;;  %1672 = vmatpush.msrb.mxu3 %v2403_v31 }
 0x273   : > { %1461 = vmatpush.msra.mxu0 %v2432_v49 }
 0x274   : > { %1621 = vmatpush.msrb.mxu2 %v2429_v48  ;;  %1674 = vmatpush.msrb.mxu3 %v2432_v49 }
 0x275   : > { %1463 = vmatpush.msra.mxu0 %v2438_v52 }
 0x276   : > { %1624 = vmatpush.msrb.mxu2 %v2449_v33  ;;  %1676 = vmatpush.msrb.mxu3 %v2438_v52 }
 0x277   : > { %1465 = vmatpush.msra.mxu0 %v2440_v53 }
 0x278   : > { %1627 = vmatpush.msrb.mxu2 %v2462_v4  ;;  %1678 = vmatpush.msrb.mxu3 %v2440_v53 }
 0x279   : > { %1467 = vmatpush.msra.mxu0 %v2452_v39 }
 0x27a   : > { %1630 = vmatpush.msrb.mxu2 %v2468_v20  ;;  %1680 = vmatpush.msrb.mxu3 %v2452_v39 }
 0x27c   : > { %1633 = vmatpush.msrb.mxu2 %v2485_v37 }
 0x2bf   : > { %v1392_v54 = vpop.permute.xlu0 %1391  ;;  %v1322_v41 = vpop.f32.mrf.mxu1 }
 0x2c0   : > { %1398 = vst.msk [vmem:[#allocation2] sm:$0xff] %vm1397_vm6, %v1392_v54  ;;  %v1431_v54 = vld [vmem:[%s2651_s7 + $0x18] sm:$0xff] }
 0x2c1   : > { %v1293_v25 = vpop.f32.mrf.mxu0 }
 0x2c5   : > { %v1231_v55 = vpop.f32.mrf.mxu2 }
 0x2c7   : > { %v1405_v56 = vpop.permute.xlu0 %1404 }
 0x2c8   : > { %1411 = vst.msk [vmem:[#allocation2] sm:$0xff] %vm1410_vm7, %v1405_v56  ;;  %v1537_v56 = vand.u32 4294901760, %v2429_v48  ;;  %v1328_v50 = vpop.f32.mrf.mxu1 }
 0x2c9   : > { %v1298_v27 = vpop.f32.mrf.mxu0 }
 0x2cd   : > { %v2328_v58 = vpop.f32.mrf.mxu2  ;;  %v1265_v59 = vpop.f32.mrf.mxu3 }
 0x2ce   : > { %v1266_v21 = vadd.f32 %v1265_v59, %v1231_v55  ;;  %v1515_v55 = vand.u32 4294901760, %v1514_v38 }
 0x2cf   : > { %v1394_v9 = vpop.permute.xlu0 %1393 }
 0x2d0   : > { %1399 = vst.msk [vmem:[#allocation2 + $0x8] sm:$0xff] %vm1397_vm6, %v1394_v9  ;;  %v1294_v24 = vadd.f32 %v1293_v25, %v1266_v21  ;;  %v1543_v9 = vand.u32 4294901760, %v2449_v33  ;;  %v2472_v25 = vand.u32 4294901760, %v1430_v57  ;;  %1516 = vmatpush.msra.mxu1 %v1515_v55 }
 0x2d2   : > { %v1323_v63 = vadd.f32 %v1322_v41, %v1294_v24  ;;  %v1428_v41 = vld [vmem:[%s2651_s7] sm:$0xff]  ;;  %1522 = vmatpush.msra.mxu1 %v1521_v8  ;;  %v1544_v24 = vsub.f32 %v2449_v33, %v1543_v9  ;;  %v2503_v47 = vsub.f32 %v1430_v57, %v2472_v25 }
 0x2d4   : > { %1528 = vmatpush.msra.mxu1 %v1527_v32  ;;  %v1545_v8 = vand.u32 4294901760, %v1544_v24 }
 0x2d5   : > { %v1269_v34 = vpop.f32.mrf.mxu3  ;;  %v1352_v45 = vpop.f32.mrf.mxu2 }
 0x2d6   : > { %v1270_v59 = vadd.f32 %v1269_v34, %v2328_v58  ;;  %v2470_v58 = vand.u32 4294901760, %v1431_v54  ;;  %v1353_v21 = vadd.f32 %v1352_v45, %v1323_v63  ;;  %v1538_v34 = vsub.f32 %v2429_v48, %v1537_v56  ;;  %1534 = vmatpush.msra.mxu1 %v1533_v40 }
 0x2d7   : > { %v1407_v46 = vpop.permute.xlu0 %1406  ;;  %v1555_v45 = vand.u32 4294901760, %v2468_v20  ;;  %v1561_v63 = vand.u32 4294901760, %v2485_v37 }
 0x2d8   : > { %1412 = vst.msk [vmem:[#allocation2 + $0x8] sm:$0xff] %vm1410_vm7, %v1407_v46  ;;  %v1299_v38 = vadd.f32 %v1298_v27, %v1270_v59  ;;  %v2497_v44 = vsub.f32 %v1431_v54, %v2470_v58  ;;  %v2499_v46 = vand.u32 4294901760, %v1429_v26  ;;  %v1539_v59 = vand.u32 4294901760, %v1538_v34  ;;  %1469 = vmatpush.msra.mxu0 %v2470_v58  ;;  %1682 = vmatpush.msrb.mxu3 %v2470_v58 }
 0x2d9   : > { %v1550_v54 = vsub.f32 %v2462_v4, %v1549_v36 }
 0x2da   : > { %v1329_v57 = vadd.f32 %v1328_v50, %v1299_v38  ;;  %v1567_v27 = vand.u32 4294901760, %v2497_v44  ;;  %1540 = vmatpush.msra.mxu1 %v1539_v59  ;;  %v1562_v38 = vsub.f32 %v2485_v37, %v1561_v63  ;;  %1471 = vmatpush.msra.mxu0 %v2472_v25 }
 0x2db   : > { %v1551_v34 = vand.u32 4294901760, %v1550_v54  ;;  %1636 = vmatpush.msrb.mxu2 %v2497_v44  ;;  %1684 = vmatpush.msrb.mxu3 %v2472_v25 }
 0x2dc   : > { %1546 = vmatpush.msra.mxu1 %v1545_v8  ;;  %1473 = vmatpush.msra.mxu0 %v2499_v46 }
 0x2dd   : > { %v1378_v28 = vpop.f32.mrf.mxu3  ;;  %v1356_v55 = vpop.f32.mrf.mxu2  ;;  %1639 = vmatpush.msrb.mxu2 %v2503_v47  ;;  %1686 = vmatpush.msrb.mxu3 %v2499_v46 }
 0x2de   : > { %v1379_v1 = vadd.f32 %v1378_v28, %v1353_v21  ;;  %v1556_v21 = vsub.f32 %v2468_v20, %v1555_v45  ;;  %v2523_v28 = vsub.f32 %v1429_v26, %v2499_v46  ;;  %v1357_v32 = vadd.f32 %v1356_v55, %v1329_v57  ;;  %1552 = vmatpush.msra.mxu1 %v1551_v34 }
 0x2e0   : > { %v1385_v42 = vmul.f32 %v1379_v1, %v2299_v35  ;;  %v2512_v35 = vand.u32 4294901760, %v1428_v41  ;;  %v1573_v1 = vand.u32 4294901760, %v2503_v47  ;;  %v1557_v24 = vand.u32 4294901760, %v1556_v21  ;;  %1642 = vmatpush.msrb.mxu2 %v2523_v28 }
 0x2e1   : > { %v1579_v50 = vand.u32 4294901760, %v2523_v28 }
 0x2e2   : > { %v1413_v0 = vmul.f32 %v1385_v42, %v2193_v2  ;;  %v2533_v26 = vsub.f32 %v1428_v41, %v2512_v35  ;;  %v1568_v42 = vsub.f32 %v2497_v44, %v1567_v27  ;;  %v1563_v41 = vand.u32 4294901760, %v1562_v38  ;;  %1558 = vmatpush.msra.mxu1 %v1557_v24  ;;  %1475 = vmatpush.msra.mxu0 %v2512_v35 }
 0x2e3   : > { %v1574_v59 = vsub.f32 %v2503_v47, %v1573_v1  ;;  %1688 = vmatpush.msrb.mxu3 %v2512_v35 }
 0x2e4   : > { %1417 = vrot.lane.b32.xlu1 %v1413_v0, %s2078_s21  ;;  %v1585_v54 = vand.u32 4294901760, %v2533_v26  ;;  %v1580_v0 = vsub.f32 %v2523_v28, %v1579_v50  ;;  %1564 = vmatpush.msra.mxu1 %v1563_v41 }
 0x2e5   : > { %v1382_v2 = vpop.f32.mrf.mxu3  ;;  %v1575_v8 = vand.u32 4294901760, %v1574_v59  ;;  %1705 = vmatpush.msrb.mxu0 %v1495_v17  ;;  %1645 = vmatpush.msrb.mxu2 %v2533_v26 }
 0x2e6   : > { %v1383_v40 = vadd.f32 %v1382_v2, %v1357_v32  ;;  %v1586_v21 = vsub.f32 %v2533_v26, %v1585_v54 }
 0x2e7   : > { %1709 = vmatpush.msrb.mxu0 %v1501_v18 }
 0x2e8   : > { %v1386_v55 = vmul.f32 %v1383_v40, %v2312_v51  ;;  %v1569_v51 = vand.u32 4294901760, %v1568_v42  ;;  %v1587_v32 = vand.u32 4294901760, %v1586_v21 }
 0x2e9   : > { %1713 = vmatpush.msrb.mxu0 %v1507_v19 }
 0x2ea   : > { %v1414_v57 = vmul.f32 %v1386_v55, %v2195_v3  ;;  %1570 = vmatpush.msra.mxu1 %v1569_v51  ;;  %v1581_v3 = vand.u32 4294901760, %v1580_v0 }
 0x2eb   : > { %1717 = vmatpush.msrb.mxu0 %v1513_v22 }
 0x2ec   : > { %1419 = vrot.lane.b32.xlu0 %v1414_v57, %s2078_s21  ;;  %1576 = vmatpush.msra.mxu1 %v1575_v8 }
 0x2ed   : > { %1721 = vmatpush.msrb.mxu0 %v1519_v29 }
 0x2ee   : > { %1582 = vmatpush.msra.mxu1 %v1581_v3 }
 0x2ef   : > { %1725 = vmatpush.msrb.mxu0 %v1525_v30 }
 0x2f0   : > { %1588 = vmatpush.msra.mxu1 %v1587_v32 }
 0x2f1   : > { %1729 = vmatpush.msrb.mxu0 %v1531_v43 }
 0x2f2   : > { %1776 = vmatpush.msrb.mxu1 %v2330_v60 }
 0x2f3   : > { %1733 = vmatpush.msrb.mxu0 %v1537_v56 }
 0x2f4   : > { %1778 = vmatpush.msrb.mxu1 %v2332_v61 }
 0x2f5   : > { %1737 = vmatpush.msrb.mxu0 %v1543_v9 }
 0x2f6   : > { %1780 = vmatpush.msrb.mxu1 %v2334_v62 }
 0x2f7   : > { %1741 = vmatpush.msrb.mxu0 %v1549_v36 }
 0x2f8   : > { %1782 = vmatpush.msrb.mxu1 %v2345_v5 }
 0x2f9   : > { %1745 = vmatpush.msrb.mxu0 %v1555_v45 }
 0x2fa   : > { %1784 = vmatpush.msrb.mxu1 %v2347_v6 }
 0x2fb   : > { %1749 = vmatpush.msrb.mxu0 %v1561_v63 }
 0x2fc   : > { %1786 = vmatpush.msrb.mxu1 %v2349_v7 }
 0x2fd   : > { %1753 = vmatpush.msrb.mxu0 %v1567_v27 }
 0x2fe   : > { %1788 = vmatpush.msrb.mxu1 %v2364_v13 }
 0x2ff   : > { %1757 = vmatpush.msrb.mxu0 %v1573_v1 }
 0x300   : > { %1790 = vmatpush.msrb.mxu1 %v2403_v31 }
 0x301   : > { %1761 = vmatpush.msrb.mxu0 %v1579_v50 }
 0x302   : > { %1792 = vmatpush.msrb.mxu1 %v2432_v49 }
 0x303   : > { %1765 = vmatpush.msrb.mxu0 %v1585_v54 }
 0x304   : > { %1794 = vmatpush.msrb.mxu1 %v2438_v52 }
 0x306   : > { %1796 = vmatpush.msrb.mxu1 %v2440_v53 }
 0x308   : > { %1798 = vmatpush.msrb.mxu1 %v2452_v39 }
 0x30a   : > { %1800 = vmatpush.msrb.mxu1 %v2470_v58 }
 0x30c   : > { %1802 = vmatpush.msrb.mxu1 %v2472_v25 }
 0x30e   : > { %1804 = vmatpush.msrb.mxu1 %v2499_v46 }
 0x310   : > { %1806 = vmatpush.msrb.mxu1 %v2512_v35 }
 0x356   : > { %v1418_v60 = vpop.permute.xlu1 %1417 }
 0x357   : > { %1424 = vst.msk [vmem:[#allocation2] sm:$0xff] %vm1423_vm8, %v1418_v60 }
 0x35e   : > { %v1420_v61 = vpop.permute.xlu0 %1419  ;;  %v1426_v62 = vld [vmem:[#allocation2] sm:$0xff] }
 0x35f   : > { %1425 = vst.msk [vmem:[#allocation2 + $0x8] sm:$0xff] %vm1423_vm8, %v1420_v61  ;;  %v1476_v5 = vand.u32 4294901760, %v1426_v62 }
 0x361   : > { %1590 = vmatmul.f32.vlgmr.msra.gmra.mxu1 %v1476_v5  ;;  %v1477_v6 = vsub.f32 %v1426_v62, %v1476_v5 }
 0x363   : > { %1648 = vmatmul.f32.vlgmr.msrb.gmra.mxu2 %v1477_v6  ;;  %v1478_v7 = vand.u32 4294901760, %v1477_v6 }
 0x365   : > { %1692 = vmatmul.f32.vlgmr.msrb.gmra.mxu3 %v1478_v7  ;;  %v1479_v10 = vsub.f32 %v1477_v6, %v1478_v7 }
 0x366   : > { %v1427_v11 = vld [vmem:[#allocation2 + $0x8] sm:$0xff] }
 0x367   : > { %v1480_v12 = vand.u32 4294901760, %v1479_v10  ;;  %v1484_v13 = vand.u32 4294901760, %v1427_v11 }
 0x369   : > { %1481 = vmatmul.f32.vlgmr.msra.gmra.mxu0 %v1480_v12  ;;  %1594 = vmatmul.f32.gmra.mxu1 %v1484_v13  ;;  %v1485_v14 = vsub.f32 %v1427_v11, %v1484_v13 }
 0x36b   : > { %1653 = vmatmul.f32.gmra.mxu2 %v1485_v14  ;;  %v1486_v15 = vand.u32 4294901760, %v1485_v14 }
 0x36d   : > { %1698 = vmatmul.f32.gmra.mxu3 %v1486_v15  ;;  %v1487_v16 = vsub.f32 %v1485_v14, %v1486_v15 }
 0x36f   : > { %v1488_v17 = vand.u32 4294901760, %v1487_v16 }
 0x371   : > { %1489 = vmatmul.f32.gmra.mxu0 %v1488_v17  ;;  %1808 = vmatmul.f32.vlgmr.msrb.gmra.mxu1 %v1476_v5 }
 0x379   : > { %1767 = vmatmul.f32.vlgmr.msrb.gmra.mxu0 %v1476_v5  ;;  %1812 = vmatmul.f32.gmra.mxu1 %v1484_v13 }
 0x381   : > { %1771 = vmatmul.f32.gmra.mxu0 %v1484_v13 }
 0x3de   : > { %v1591_v18 = vpop.f32.mrf.mxu1 }
 0x3e6   : > { %v1482_v19 = vpop.f32.mrf.mxu0  ;;  %v1595_v22 = vpop.f32.mrf.mxu1 }
 0x3e7   : > { %v1592_v23 = vadd.f32 %v1591_v18, %v1482_v19  ;;  %v1649_v29 = vpop.f32.mrf.mxu2 }
 0x3e8   : > { %v1693_v43 = vpop.f32.mrf.mxu3 }
 0x3e9   : > { %v1650_v31 = vadd.f32 %v1649_v29, %v1592_v23 }
 0x3eb   : > { %v1694_v48 = vadd.f32 %v1693_v43, %v1650_v31 }
 0x3ee   : > { %v1490_v30 = vpop.f32.mrf.mxu0  ;;  %v1809_v52 = vpop.f32.mrf.mxu1 }
 0x3ef   : > { %v1596_v49 = vadd.f32 %v1595_v22, %v1490_v30  ;;  %v1654_v33 = vpop.f32.mrf.mxu2 }
 0x3f0   : > { %v1699_v9 = vpop.f32.mrf.mxu3 }
 0x3f1   : > { %v1655_v39 = vadd.f32 %v1654_v33, %v1596_v49 }
 0x3f3   : > { %v1700_v20 = vadd.f32 %v1699_v9, %v1655_v39 }
 0x3f6   : > { %v1768_v53 = vpop.f32.mrf.mxu0  ;;  %v1813_v36 = vpop.f32.mrf.mxu1 }
 0x3f7   : > { %v1769_v56 = vadd.f32 %v1768_v53, %v1694_v48 }
 0x3f9   : > { %v1810_v4 = vadd.f32 %v1809_v52, %v1769_v56 }
 0x3fb   : > { %1816 = vst.msk [vmem:[%s337_s10] sm:$0xff] %vm369_vm0, %v1810_v4 }
 0x3fe   : > { %v1772_v58 = vpop.f32.mrf.mxu0 }
 0x3ff   : > { %v1773_v25 = vadd.f32 %v1772_v58, %v1700_v20 }
 0x401   : > { %v1814_v37 = vadd.f32 %v1813_v36, %v1773_v25 }
 0x403   : > { %1817 = vst.msk [vmem:[%s337_s10 + $0x8] sm:$0xff] %vm369_vm0, %v1814_v37 }
 0x404   : > { %2038 = shalt.err (!%p2035_p3)
}
 0x405   : > { %s2079_s22 = smov 128   ;;  %s2080_s17 = smov 8  }
 0x406   : > { %1947 = dma.vmem_to_hbm [thread:$0]  (%p2164_p5), %s1832_s12, 256, %s1834_s13, %s1819_s9, %s2079_s22, %s2079_s22, %s2080_s17  }
 0x407 PF: > { %p1953_p4 = scmp.ge.s32.totalorder %s2073_s30, 2  ;;  %s1848_s26 = sand.u32 1, %s2061_s27  }
 0x408   : > { %s1849_s10 = scalar_lea.sflag [#allocation4], %s1848_s26 }
 0x409   : > { %p1950_p7 = pnand %p1953_p4, %p2168_p6 }
 0x40b   : > { %p1951_p8 = pneg %p1950_p7 }
 0x40d   : > { %2056 = dma.done.wait (%p1951_p8), %s1849_s10, 256  }
 0x40e   : > { %2058 = vsyncadd (%p1951_p8), %s1849_s10, 4294967040  ;;  %p18_p9 = scmp.ge.s32.totalorder %s2151_s11, 4   ;;  %s2657_s27 = smov %s2065_s28 }
 0x40f   : > { %s2658_s28 = smov %s2069_s29  ;;  %s2659_s29 = smov %s2162_s14 }
 0x410   : > { %s2660_s30 = smov %s2151_s11  ;;  %20 = sbr.rel (!%p18_p9) target bundleno = 3 (0x3), region = 96 }
 0x415   :  { %1855 = vsyncpa [#allocation4], 1 }
 0x416   :  { %1857 = vsyncpa [#allocation4 + $0x1], 1 }

</bundles_post_ra>
